<compile_context>
chip_gen: v7x
topology: tpu7x:2x2x1
jax: 0.10.0
libtpu: 0.0.40
codegen_flags: <defaults>
</compile_context>

<pallas_src>
import functools

import jax
import jax.numpy as jnp
from jax import lax
from jax.experimental import pallas as pl
from jax.experimental.pallas import tpu as pltpu


def _round_up(x, m):
    return (x + m - 1) // m * m


def _choose_block_k(m_pad, k):
    """K-tile size: keep one (m_pad, block_k) f32 feature block around <= 4 MiB."""
    budget_bytes = 4 * 1024 * 1024
    bk = budget_bytes // (m_pad * 4)
    bk = max(128, (bk // 128) * 128)
    return min(bk, _round_up(k, 128))


def _vmem_limit_bytes(m_pad, block_k, num_mm_arrays):
    # double-buffered (m_pad, block_k) feature tiles + resident (m_pad, m_pad)
    # arrays (gram output, optional target), with 2x headroom.
    need = 2 * m_pad * block_k * 4 + num_mm_arrays * m_pad * m_pad * 4
    return int(min(max(2 * need, 32 * 1024 * 1024), 56 * 1024 * 1024))


def _pad_features(x_nchw):
    """(N, C, H, W) -> zero-padded (M_pad, K_pad) features + true sizes."""
    n, c, h, w = x_nchw.shape
    m, k = n * c, h * w
    m_pad = _round_up(m, 128)
    block_k = _choose_block_k(m_pad, k)
    k_pad = _round_up(k, block_k)
    f = jnp.reshape(x_nchw, (m, k))
    if (m_pad, k_pad) != (m, k):
        f = jnp.pad(f, ((0, m_pad - m), (0, k_pad - k)))
    return f, m, k, m_pad, block_k


def _accumulate_gram(feat_ref, gram_ref):
    # gram_ref is resident across the K grid axis -> use it as the f32 accumulator.
    @pl.when(pl.program_id(0) == 0)
    def _init():
        gram_ref[...] = jnp.zeros_like(gram_ref)

    f = feat_ref[...]
    # f @ f.T without materializing a transpose: contract the last dim of both
    # operands so Mosaic feeds the MXU directly (f32 accumulation).
    gram_ref[...] += lax.dot_general(
        f, f,
        dimension_numbers=(((1,), (1,)), ((), ())),
        preferred_element_type=jnp.float32,
    )


def _gram_kernel(feat_ref, gram_ref, *, inv_norm):
    _accumulate_gram(feat_ref, gram_ref)

    @pl.when(pl.program_id(0) == pl.num_programs(0) - 1)
    def _finalize():
        gram_ref[...] = gram_ref[...] * inv_norm


def _gram_mse_kernel(feat_ref, tgt_ref, gram_ref, loss_ref, *, inv_norm, inv_mm):
    _accumulate_gram(feat_ref, gram_ref)

    @pl.when(pl.program_id(0) == pl.num_programs(0) - 1)
    def _finalize():
        g = gram_ref[...] * inv_norm
        gram_ref[...] = g
        diff = g - tgt_ref[...]
        # Single cross-lane reduce, issued once per kernel (XLU slot, off the
        # MXU critical path).  Divide by the *true* (N*C)^2, not padded size.
        loss_ref[0, 0] = jnp.sum(diff * diff) * inv_mm


def gram_matrix_pallas(x_nchw):
    """Padded gram matrix of an NCHW feature map (target-construction path)."""
    f, m, k, m_pad, block_k = _pad_features(x_nchw)
    grid = (f.shape[1] // block_k,)
    kernel = functools.partial(_gram_kernel, inv_norm=1.0 / float(m * k))
    gram = pl.pallas_call(
        kernel,
        out_shape=jax.ShapeDtypeStruct((m_pad, m_pad), jnp.float32),
        grid=grid,
        in_specs=[pl.BlockSpec((m_pad, block_k), lambda kk: (0, kk))],
        out_specs=pl.BlockSpec((m_pad, m_pad), lambda kk: (0, 0)),
        compiler_params=pltpu.CompilerParams(
            dimension_semantics=("arbitrary",),
            vmem_limit_bytes=_vmem_limit_bytes(m_pad, block_k, 1),
        ),
    )(f)
    return gram, m


def gram_and_mse_pallas(x_nchw, target_gram_padded):
    """Fused gram + MSE-vs-target for the StyleLoss forward pass."""
    f, m, k, m_pad, block_k = _pad_features(x_nchw)
    if target_gram_padded.shape != (m_pad, m_pad):
        raise ValueError("target gram was built for a different N*C")
    grid = (f.shape[1] // block_k,)
    kernel = functools.partial(
        _gram_mse_kernel,
        inv_norm=1.0 / float(m * k),
        inv_mm=1.0 / float(m * m),
    )
    gram, loss = pl.pallas_call(
        kernel,
        out_shape=(
            jax.ShapeDtypeStruct((m_pad, m_pad), jnp.float32),
            jax.ShapeDtypeStruct((1, 1), jnp.float32),
        ),
        grid=grid,
        in_specs=[
            pl.BlockSpec((m_pad, block_k), lambda kk: (0, kk)),
            pl.BlockSpec((m_pad, m_pad), lambda kk: (0, 0)),
        ],
        out_specs=(
            pl.BlockSpec((m_pad, m_pad), lambda kk: (0, 0)),
            pl.BlockSpec((1, 1), lambda kk: (0, 0), memory_space=pltpu.SMEM),
        ),
        compiler_params=pltpu.CompilerParams(
            dimension_semantics=("arbitrary",),
            vmem_limit_bytes=_vmem_limit_bytes(m_pad, block_k, 2),
        ),
    )(f, target_gram_padded)
    return gram, loss[0, 0]


class StyleLoss:
    """JAX/Pallas port of the PyTorch StyleLoss module."""

    def __init__(self, target_feature):
        gram_padded, m = gram_matrix_pallas(target_feature)
        self._m = m
        self._target_padded = gram_padded          # padded rows/cols are zero
        self.target = gram_padded[:m, :m]          # same as the PyTorch buffer
        self.loss = None

    def forward(self, x):
        _, loss = gram_and_mse_pallas(x, self._target_padded)
        self.loss = loss
        return x  # pass-through, same as the PyTorch module

    __call__ = forward


def _gram_ref(t):
    n, c, h, w = t.shape
    fr = jnp.reshape(t, (n * c, h * w)).astype(jnp.float32)
    return (fr @ fr.T) / (n * c * h * w)


if __name__ == "__main__":
    key = jax.random.PRNGKey(0)
    k1, k2 = jax.random.split(key)

    # Small NCHW feature maps consistent with the module.
    target_feature = jax.random.normal(k1, (2, 4, 16, 16), dtype=jnp.float32)
    x = jax.random.normal(k2, (2, 4, 16, 16), dtype=jnp.float32)

    module = StyleLoss(target_feature)
    out = jax.block_until_ready(module(x))
    loss = jax.block_until_ready(module.loss)

    # Pure-JAX reference (gram + mse).
    g_ref = _gram_ref(x)
    t_ref = _gram_ref(target_feature)
    loss_ref = jnp.mean((g_ref - t_ref) ** 2)

    assert out.shape == x.shape and out.dtype == x.dtype
    assert jnp.allclose(out, x)
    assert jnp.allclose(module.target, t_ref, atol=1e-5, rtol=1e-4)
    assert jnp.allclose(loss, loss_ref, atol=1e-5, rtol=1e-4)

    print("KERNEL_OK")
</pallas_src>

<mosaic_0001>
module attributes {stable_mosaic.version = 11 : i64} {
  func.func @_gram_kernel(%arg0: i32, %arg1: memref<128x256xf32, #tpu.memory_space<vmem>>, %arg2: memref<128x128xf32, #tpu.memory_space<vmem>>) attributes {dimension_semantics = [#tpu.dimension_semantics<arbitrary>], iteration_bounds = array<i64: 1>, scalar_prefetch = 0 : i64, scratch_operands = 0 : i64, tpu.core_type = #tpu.core_type<tc>, window_params = [{transform_indices = @transform_0, window_bounds = array<i64: 128, 256>}, {pipeline_mode = #tpu.pipeline_mode<synchronous>, transform_indices = @transform_1, window_bounds = array<i64: 128, 128>}]} {
    %c0_i32 = arith.constant 0 : i32
    %0 = arith.cmpi eq, %arg0, %c0_i32 : i32
    %1 = arith.extui %0 : i1 to i32
    %c0_i32_0 = arith.constant 0 : i32
    %2 = arith.cmpi ne, %1, %c0_i32_0 : i32
    scf.if %2 {
      %cst_8 = arith.constant 0.000000e+00 : f32
      %11 = vector.broadcast %cst_8 : f32 to vector<128x128xf32>
      %c0_9 = arith.constant 0 : index
      %c0_10 = arith.constant 0 : index
      %12 = vector.load %arg2[%c0_9, %c0_10] : memref<128x128xf32, #tpu.memory_space<vmem>>, vector<128x128xf32>
      tpu.vector_store %arg2[%c0_9, %c0_10], %11 {strides = array<i32>} : memref<128x128xf32, #tpu.memory_space<vmem>>, vector<128x128xf32>,
    } else {
    }
    %c0 = arith.constant 0 : index
    %c0_1 = arith.constant 0 : index
    %3 = vector.load %arg1[%c0, %c0_1] : memref<128x256xf32, #tpu.memory_space<vmem>>, vector<128x256xf32>
    %c0_2 = arith.constant 0 : index
    %c0_3 = arith.constant 0 : index
    %4 = vector.load %arg2[%c0_2, %c0_3] : memref<128x128xf32, #tpu.memory_space<vmem>>, vector<128x128xf32>
    %cst = arith.constant dense<0.000000e+00> : vector<128x128xf32>
    %5 = tpu.matmul %3, %3, %cst {dimension_numbers = #tpu.dot_dimension_numbers<[1], [1], [0], [0], [0, 0, 1, 0], [], []>} : vector<128x256xf32>, vector<128x256xf32>, vector<128x128xf32> -> vector<128x128xf32>
    %6 = arith.addf %4, %5 : vector<128x128xf32>
    %c0_4 = arith.constant 0 : index
    %c0_5 = arith.constant 0 : index
    %7 = vector.load %arg2[%c0_4, %c0_5] : memref<128x128xf32, #tpu.memory_space<vmem>>, vector<128x128xf32>
    tpu.vector_store %arg2[%c0_4, %c0_5], %6 {strides = array<i32>} : memref<128x128xf32, #tpu.memory_space<vmem>>, vector<128x128xf32>,
    %c0_i32_6 = arith.constant 0 : i32
    %8 = arith.cmpi eq, %arg0, %c0_i32_6 : i32
    %9 = arith.extui %8 : i1 to i32
    %c0_i32_7 = arith.constant 0 : i32
    %10 = arith.cmpi ne, %9, %c0_i32_7 : i32
    scf.if %10 {
      %c0_8 = arith.constant 0 : index
      %c0_9 = arith.constant 0 : index
      %11 = vector.load %arg2[%c0_8, %c0_9] : memref<128x128xf32, #tpu.memory_space<vmem>>, vector<128x128xf32>
      %cst_10 = arith.constant 4.8828125E-4 : f32
      %12 = vector.broadcast %cst_10 : f32 to vector<128x128xf32>
      %13 = arith.mulf %11, %12 : vector<128x128xf32>
      %c0_11 = arith.constant 0 : index
      %c0_12 = arith.constant 0 : index
      %14 = vector.load %arg2[%c0_11, %c0_12] : memref<128x128xf32, #tpu.memory_space<vmem>>, vector<128x128xf32>
      tpu.vector_store %arg2[%c0_11, %c0_12], %13 {strides = array<i32>} : memref<128x128xf32, #tpu.memory_space<vmem>>, vector<128x128xf32>,
    } else {
    }
    return
  }
  func.func @transform_0(%arg0: i32) -> (i32, i32) {
    %c0_i32 = arith.constant 0 : i32
    %c0_i32_0 = arith.constant 0 : i32
    return %c0_i32, %arg0 : i32, i32
  }
  func.func @transform_1(%arg0: i32) -> (i32, i32) {
    %c0_i32 = arith.constant 0 : i32
    %c0_i32_0 = arith.constant 0 : i32
    %c0_i32_1 = arith.constant 0 : i32
    return %c0_i32, %c0_i32_0 : i32, i32
  }
}

</mosaic_0001>

<bundles_post_ra>
// kernel: tpu_custom_call.1
= control target key start
LH: loop header
LB: loop body
LE: loop exit
PB: predicated region body
PF: predicated region fallthrough
CT: control target
= control target key end

     0   :  { %6 = vsyncpa [#allocation3], 0  ;;  %s539_s0 = inlined_call_operand.hbm [shape: f32[128,256], index: 0, kind: input, shape index: {}]   ;;  %s540_s1 = inlined_call_operand.hbm [shape: f32[128,128], index: 1, kind: output, shape index: {}]  }
   0x1   :  { %7 = vsyncpa [#allocation4], 0  ;;  %s439_s6 = smov [#allocation2]   ;;  %s391_s10 = scalar_lea.hbm %s539_s0, 4096 }
   0x2   :  { %s13_s7 = sshll.u32 %s439_s6, 4  ;;  %p392_p0 = scmp.ne.s32.totalorder %s539_s0, %s391_s10  ;;  %s14_s7 = int_to_ptr.vmem [resolvable:$true] %s13_s7 }
   0x3   :  { %p395_p1 = scmp.lt.u32.totalorder %s391_s10, %s539_s0 }
   0x5   :  { %p397_p2 = pnand %p395_p1, %p392_p0 }
   0x7   :  { %400 = shalt.err (!%p397_p2)
}
   0x8   :  { %s401_s15 = scalar_lea.vmem %s14_s7, 4096  ;;  %p406_p4 = scmp.lt.s32.totalorder %s14_s7, %s14_s7 }
   0x9   :  { %p402_p3 = scmp.ne.s32.totalorder %s14_s7, %s401_s15  ;;  %p407_p5 = scmp.lt.s32.totalorder %s401_s15, %s401_s15 }
   0xb   :  { %p408_p6 = por %p407_p5, %p406_p4 }
   0xd   :  { %p409_p7 = pnand %p408_p6, %p402_p3 }
   0xf   :  { %412 = shalt.err (!%p409_p7)
}
  0x10   :  { %s440_s16 = smov 256   ;;  %s441_s17 = smov 16  }
  0x11   :  { %19 = dma.hbm_to_vmem [thread:$0]  %s539_s0, 4096, %s14_s7, [#allocation3], %s440_s16, %s440_s16, %s441_s17  }
  0x12   :  { %435 = dma.done.wait [#allocation3], 4096  }
  0x13   :  { %436 = vsyncadd [#allocation3], 4294963200  ;;  %v44_v0 = vld [vmem:[#allocation2 + $0x8] sm:$0xff]  ;;  %v467_v1 = vld [vmem:[#allocation2 + $0x18] sm:$0xff]  ;;  %s442_s0 = smov [#allocation5]  }
  0x14   :  { %v469_v2 = vld [vmem:[#allocation2] sm:$0xff]  ;;  %v336_v3 = vpack.c.bf16 %v467_v1, %v44_v0  ;;  %v472_v4 = vld [vmem:[#allocation2 + $0x10] sm:$0xff]  ;;  %v474_v5 = vld [vmem:[#allocation2 + $0x28] sm:$0xff]  ;;  %155 = vmatprep.mubr.f32.mxu0 %v44_v0  ;;  %s324_s20 = sshll.u32 %s442_s0, 4  ;;  %s325_s20 = int_to_ptr.vmem [resolvable:$true] %s324_s20 }
  0x15   :  { %v476_v6 = vld [vmem:[#allocation2 + $0x38] sm:$0xff]  ;;  %v338_v7 = vpack.c.bf16 %v472_v4, %v469_v2  ;;  %v482_v9 = vld [vmem:[#allocation2 + $0x20] sm:$0xff]  ;;  %v484_v10 = vld [vmem:[#allocation2 + $0x30] sm:$0xff]  ;;  %s413_s21 = scalar_lea.vmem %s325_s20, 2048  ;;  %p418_p9 = scmp.lt.s32.totalorder %s325_s20, %s325_s20 }
  0x16   :  { %v340_v8 = vpack.c.bf16 %v476_v6, %v474_v5  ;;  %337 = vmatprep.subr.bf16.mxu0 %v336_v3  ;;  %368 = vmatprep.subr.bf16.mxu1 %v336_v3  ;;  %v60_v11 = vld [vmem:[#allocation2 + $0x88] sm:$0xff]  ;;  %v488_v13 = vld [vmem:[#allocation2 + $0x58] sm:$0xff]  ;;  %v342_v14 = vpack.c.bf16 %v484_v10, %v482_v9  ;;  %v494_v16 = vld [vmem:[#allocation2 + $0x40] sm:$0xff]  ;;  %p414_p8 = scmp.ne.s32.totalorder %s325_s20, %s413_s21  ;;  %p419_p10 = scmp.lt.s32.totalorder %s413_s21, %s413_s21 }
  0x17   :  { %339 = vmatpush1.bf16.xpose.msra.mxu0 %v338_v7  ;;  %376 = vmatpush1.bf16.xpose.msra.mxu1 %v338_v7  ;;  %v486_v12 = vld [vmem:[#allocation2 + $0x48] sm:$0xff]  ;;  %v496_v17 = vld [vmem:[#allocation2 + $0x50] sm:$0xff]  ;;  %v500_v19 = vld [vmem:[#allocation2 + $0x78] sm:$0xff] }
  0x18   :  { %341 = vmatprep.subr.bf16.mxu0 %v340_v8  ;;  %369 = vmatprep.subr.bf16.mxu1 %v340_v8  ;;  %v344_v15 = vpack.c.bf16 %v488_v13, %v486_v12  ;;  %v498_v18 = vld [vmem:[#allocation2 + $0x68] sm:$0xff]  ;;  %v346_v20 = vpack.c.bf16 %v496_v17, %v494_v16  ;;  %v506_v22 = vld [vmem:[#allocation2 + $0x60] sm:$0xff]  ;;  %v508_v23 = vld [vmem:[#allocation2 + $0x70] sm:$0xff]  ;;  %p420_p11 = por %p419_p10, %p418_p9 }
  0x19   :  { %195 = vmatprep.mubr.f32.mxu1 %v60_v11  ;;  %v348_v21 = vpack.c.bf16 %v500_v19, %v498_v18  ;;  %v62_v24 = vld [vmem:[#allocation2 + $0x98] sm:$0xff]  ;;  %v350_v25 = vpack.c.bf16 %v508_v23, %v506_v22  ;;  %v59_v27 = vld [vmem:[#allocation2 + $0x80] sm:$0xff]  ;;  %v61_v28 = vld [vmem:[#allocation2 + $0x90] sm:$0xff] }
  0x1a   :  { %v352_v26 = vpack.c.bf16 %v62_v24, %v60_v11  ;;  %v64_v29 = vld [vmem:[#allocation2 + $0xa8] sm:$0xff]  ;;  %v66_v30 = vld [vmem:[#allocation2 + $0xb8] sm:$0xff]  ;;  %v354_v31 = vpack.c.bf16 %v61_v28, %v59_v27  ;;  %v63_v33 = vld [vmem:[#allocation2 + $0xa0] sm:$0xff]  ;;  %p421_p12 = pnand %p420_p11, %p414_p8 }
  0x1b   :  { %v356_v32 = vpack.c.bf16 %v66_v30, %v64_v29  ;;  %v65_v34 = vld [vmem:[#allocation2 + $0xb0] sm:$0xff]  ;;  %v68_v35 = vld [vmem:[#allocation2 + $0xc8] sm:$0xff]  ;;  %v70_v36 = vld [vmem:[#allocation2 + $0xd8] sm:$0xff] }
  0x1c   :  { %v358_v37 = vpack.c.bf16 %v65_v34, %v63_v33  ;;  %v360_v38 = vpack.c.bf16 %v70_v36, %v68_v35  ;;  %v67_v39 = vld [vmem:[#allocation2 + $0xc0] sm:$0xff]  ;;  %v69_v40 = vld [vmem:[#allocation2 + $0xd0] sm:$0xff]  ;;  %v72_v41 = vld [vmem:[#allocation2 + $0xe8] sm:$0xff] }
  0x1d   :  { %v74_v42 = vld [vmem:[#allocation2 + $0xf8] sm:$0xff]  ;;  %v362_v43 = vpack.c.bf16 %v69_v40, %v67_v39  ;;  %v71_v45 = vld [vmem:[#allocation2 + $0xe0] sm:$0xff]  ;;  %v73_v46 = vld [vmem:[#allocation2 + $0xf0] sm:$0xff] }
  0x1e   :  { %v364_v44 = vpack.c.bf16 %v74_v42, %v72_v41  ;;  %v366_v47 = vpack.c.bf16 %v73_v46, %v71_v45 }
  0x1f   :  { %343 = vmatpush1.bf16.xpose.msra.mxu0 %v342_v14  ;;  %377 = vmatpush1.bf16.xpose.msra.mxu1 %v342_v14 }
  0x20   :  { %345 = vmatprep.subr.bf16.mxu0 %v344_v15  ;;  %370 = vmatprep.subr.bf16.mxu1 %v344_v15 }
  0x27   :  { %347 = vmatpush1.bf16.xpose.msra.mxu0 %v346_v20  ;;  %378 = vmatpush1.bf16.xpose.msra.mxu1 %v346_v20 }
  0x28   :  { %349 = vmatprep.subr.bf16.mxu0 %v348_v21  ;;  %371 = vmatprep.subr.bf16.mxu1 %v348_v21 }
  0x2f   :  { %351 = vmatpush1.bf16.xpose.msra.mxu0 %v350_v25  ;;  %379 = vmatpush1.bf16.xpose.msra.mxu1 %v350_v25 }
  0x30   :  { %353 = vmatprep.subr.bf16.mxu0 %v352_v26  ;;  %372 = vmatprep.subr.bf16.mxu1 %v352_v26 }
  0x37   :  { %355 = vmatpush1.bf16.xpose.msra.mxu0 %v354_v31  ;;  %380 = vmatpush1.bf16.xpose.msra.mxu1 %v354_v31 }
  0x38   :  { %357 = vmatprep.subr.bf16.mxu0 %v356_v32  ;;  %373 = vmatprep.subr.bf16.mxu1 %v356_v32 }
  0x3f   :  { %359 = vmatpush1.bf16.xpose.msra.mxu0 %v358_v37  ;;  %381 = vmatpush1.bf16.xpose.msra.mxu1 %v358_v37 }
  0x40   :  { %361 = vmatprep.subr.bf16.mxu0 %v360_v38  ;;  %374 = vmatprep.subr.bf16.mxu1 %v360_v38 }
  0x47   :  { %363 = vmatpush1.bf16.xpose.msra.mxu0 %v362_v43  ;;  %382 = vmatpush1.bf16.xpose.msra.mxu1 %v362_v43 }
  0x48   :  { %365 = vmatprep.subr.bf16.mxu0 %v364_v44  ;;  %375 = vmatprep.subr.bf16.mxu1 %v364_v44 }
  0x4f   :  { %367 = vmatpush1.bf16.xpose.msra.mxu0 %v366_v47  ;;  %383 = vmatpush1.bf16.xpose.msra.mxu1 %v366_v47 }
  0x56   :  { %156 = vmatmul.mubr.f32.vlgmr.msra.gmra.mrb[0].mxu0 %v469_v2  ;;  %196 = vmatmul.mubr.f32.vlgmr.msra.gmra.mrb[0].mxu1 %v59_v27 }
  0x57   :  { %160 = vmatprep.mubr.f32.mxu0 %v467_v1  ;;  %200 = vmatprep.mubr.f32.mxu1 %v62_v24 }
  0x5a   :  { %161 = vmatmul.mubr.f32.gmra.mrb[2].mxu0 %v472_v4  ;;  %201 = vmatmul.mubr.f32.gmra.mrb[2].mxu1 %v61_v28 }
  0x5b   :  { %165 = vmatprep.mubr.f32.mxu0 %v474_v5  ;;  %205 = vmatprep.mubr.f32.mxu1 %v64_v29 }
  0x5e   :  { %166 = vmatmul.mubr.f32.gmra.mrb[4].mxu0 %v482_v9  ;;  %206 = vmatmul.mubr.f32.gmra.mrb[4].mxu1 %v63_v33 }
  0x5f   :  { %170 = vmatprep.mubr.f32.mxu0 %v476_v6  ;;  %210 = vmatprep.mubr.f32.mxu1 %v66_v30 }
  0x62   :  { %171 = vmatmul.mubr.f32.gmra.mrb[6].mxu0 %v484_v10  ;;  %211 = vmatmul.mubr.f32.gmra.mrb[6].mxu1 %v65_v34 }
  0x63   :  { %175 = vmatprep.mubr.f32.mxu0 %v486_v12  ;;  %215 = vmatprep.mubr.f32.mxu1 %v68_v35 }
  0x66   :  { %176 = vmatmul.mubr.f32.gmra.mrb[8].mxu0 %v494_v16  ;;  %216 = vmatmul.mubr.f32.gmra.mrb[8].mxu1 %v67_v39 }
  0x67   :  { %180 = vmatprep.mubr.f32.mxu0 %v488_v13  ;;  %220 = vmatprep.mubr.f32.mxu1 %v70_v36 }
  0x6a   :  { %181 = vmatmul.mubr.f32.gmra.mrb[10].mxu0 %v496_v17  ;;  %221 = vmatmul.mubr.f32.gmra.mrb[10].mxu1 %v69_v40 }
  0x6b   :  { %185 = vmatprep.mubr.f32.mxu0 %v498_v18  ;;  %225 = vmatprep.mubr.f32.mxu1 %v72_v41 }
  0x6e   :  { %186 = vmatmul.mubr.f32.gmra.mrb[12].mxu0 %v506_v22  ;;  %226 = vmatmul.mubr.f32.gmra.mrb[12].mxu1 %v71_v45 }
  0x6f   :  { %190 = vmatprep.mubr.f32.mxu0 %v500_v19  ;;  %230 = vmatprep.mubr.f32.mxu1 %v74_v42 }
  0x72   :  { %191 = vmatmul.mubr.f32.gmra.mrb[14].mxu0 %v508_v23  ;;  %231 = vmatmul.mubr.f32.gmra.mrb[14].mxu1 %v73_v46 }
 0x129   :  { %v157_v48 = vpop.f32.mrb[0].mxu0  ;;  %v197_v49 = vpop.f32.mrb[0].mxu1 }
 0x12a   :  { %v159_v50 = vpop.f32.mrb[1].mxu0  ;;  %v199_v51 = vpop.f32.mrb[1].mxu1  ;;  %v287_v52 = vmul.f32 0.00048828125, %v157_v48  ;;  %v295_v53 = vmul.f32 0.00048828125, %v197_v49 }
 0x12c   :  { %303 = vst [vmem:[#allocation5] sm:$0xff] %v287_v52  ;;  %311 = vst [vmem:[#allocation5 + $0x40] sm:$0xff] %v295_v53 }
 0x12d   :  { %v162_v54 = vpop.f32.mrb[2].mxu0  ;;  %v202_v55 = vpop.f32.mrb[2].mxu1 }
 0x12e   :  { %v164_v56 = vpop.f32.mrb[3].mxu0  ;;  %v204_v57 = vpop.f32.mrb[3].mxu1  ;;  %v288_v58 = vmul.f32 0.00048828125, %v162_v54  ;;  %v296_v59 = vmul.f32 0.00048828125, %v202_v55 }
 0x130   :  { %304 = vst [vmem:[#allocation5 + $0x8] sm:$0xff] %v288_v58  ;;  %312 = vst [vmem:[#allocation5 + $0x48] sm:$0xff] %v296_v59 }
 0x131   :  { %v167_v60 = vpop.f32.mrb[4].mxu0  ;;  %v207_v61 = vpop.f32.mrb[4].mxu1 }
 0x132   :  { %v169_v62 = vpop.f32.mrb[5].mxu0  ;;  %v209_v63 = vpop.f32.mrb[5].mxu1  ;;  %v289_v0 = vmul.f32 0.00048828125, %v167_v60  ;;  %v297_v1 = vmul.f32 0.00048828125, %v207_v61 }
 0x134   :  { %305 = vst [vmem:[#allocation5 + $0x10] sm:$0xff] %v289_v0  ;;  %313 = vst [vmem:[#allocation5 + $0x50] sm:$0xff] %v297_v1 }
 0x135   :  { %v172_v2 = vpop.f32.mrb[6].mxu0  ;;  %v212_v3 = vpop.f32.mrb[6].mxu1 }
 0x136   :  { %v174_v4 = vpop.f32.mrb[7].mxu0  ;;  %v214_v5 = vpop.f32.mrb[7].mxu1  ;;  %v290_v6 = vmul.f32 0.00048828125, %v172_v2  ;;  %v298_v7 = vmul.f32 0.00048828125, %v212_v3 }
 0x138   :  { %306 = vst [vmem:[#allocation5 + $0x18] sm:$0xff] %v290_v6  ;;  %314 = vst [vmem:[#allocation5 + $0x58] sm:$0xff] %v298_v7 }
 0x139   :  { %v177_v8 = vpop.f32.mrb[8].mxu0  ;;  %v217_v9 = vpop.f32.mrb[8].mxu1 }
 0x13a   :  { %v179_v10 = vpop.f32.mrb[9].mxu0  ;;  %v219_v11 = vpop.f32.mrb[9].mxu1  ;;  %v291_v12 = vmul.f32 0.00048828125, %v177_v8  ;;  %v299_v13 = vmul.f32 0.00048828125, %v217_v9 }
 0x13c   :  { %307 = vst [vmem:[#allocation5 + $0x20] sm:$0xff] %v291_v12  ;;  %315 = vst [vmem:[#allocation5 + $0x60] sm:$0xff] %v299_v13 }
 0x13d   :  { %v182_v14 = vpop.f32.mrb[10].mxu0  ;;  %v222_v15 = vpop.f32.mrb[10].mxu1 }
 0x13e   :  { %v184_v16 = vpop.f32.mrb[11].mxu0  ;;  %v224_v17 = vpop.f32.mrb[11].mxu1  ;;  %v292_v18 = vmul.f32 0.00048828125, %v182_v14  ;;  %v300_v19 = vmul.f32 0.00048828125, %v222_v15 }
 0x140   :  { %308 = vst [vmem:[#allocation5 + $0x28] sm:$0xff] %v292_v18  ;;  %316 = vst [vmem:[#allocation5 + $0x68] sm:$0xff] %v300_v19 }
 0x141   :  { %v187_v20 = vpop.f32.mrb[12].mxu0  ;;  %v227_v21 = vpop.f32.mrb[12].mxu1 }
 0x142   :  { %v189_v22 = vpop.f32.mrb[13].mxu0  ;;  %v229_v23 = vpop.f32.mrb[13].mxu1  ;;  %v293_v24 = vmul.f32 0.00048828125, %v187_v20  ;;  %v301_v25 = vmul.f32 0.00048828125, %v227_v21 }
 0x144   :  { %309 = vst [vmem:[#allocation5 + $0x30] sm:$0xff] %v293_v24  ;;  %317 = vst [vmem:[#allocation5 + $0x70] sm:$0xff] %v301_v25 }
 0x145   :  { %v192_v26 = vpop.f32.mrb[14].mxu0  ;;  %v232_v27 = vpop.f32.mrb[14].mxu1 }
 0x146   :  { %v194_v28 = vpop.f32.mrb[15].mxu0  ;;  %v234_v29 = vpop.f32.mrb[15].mxu1  ;;  %v294_v30 = vmul.f32 0.00048828125, %v192_v26  ;;  %v302_v31 = vmul.f32 0.00048828125, %v232_v27 }
 0x148   :  { %310 = vst [vmem:[#allocation5 + $0x38] sm:$0xff] %v294_v30  ;;  %318 = vst [vmem:[#allocation5 + $0x78] sm:$0xff] %v302_v31 }
 0x149   :  { %424 = shalt.err (!%p421_p12)
}
 0x14a   :  { %s425_s24 = scalar_lea.hbm %s540_s1, 2048 }
 0x14b   :  { %p426_p13 = scmp.ne.s32.totalorder %s540_s1, %s425_s24  ;;  %p429_p0 = scmp.lt.u32.totalorder %s425_s24, %s540_s1 }
 0x14d   :  { %p431_p1 = pnand %p429_p0, %p426_p13 }
 0x14f   :  { %434 = shalt.err (!%p431_p1)
}
 0x150   :  { %s443_s29 = smov 128   ;;  %s444_s30 = smov 8  }
 0x151   :  { %330 = dma.vmem_to_hbm [thread:$0]  %s325_s20, 2048, %s540_s1, [#allocation4], %s443_s29, %s443_s29, %s444_s30  }
 0x152   :  { %437 = dma.done.wait [#allocation4], 2048  }
 0x153   :  { %438 = vsyncadd [#allocation4], 4294965248 }
 0x154   :  { %334 = vsyncpa [#allocation3], 1 }
 0x155   :  { %335 = vsyncpa [#allocation4], 1 }

</bundles_post_ra>
